<compile_context>
chip_gen: v7x
topology: tpu7x:2x2x1
jax: 0.10.0
libtpu: 0.0.40
codegen_flags: <defaults>
</compile_context>

<pallas_src>
import functools

import jax
import jax.numpy as jnp
from jax.experimental import pallas as pl
from jax.experimental.pallas import tpu as pltpu


def _round_up(x, m):
    return ((x + m - 1) // m) * m


def _odesde_kernel(num_layers, x_ref, not_first_ref, not_last_ref, *refs):
    """Whole OdeSdeFuncNet forward in one invocation (grid=()).

    x_ref:         (Cin, NL_pad)  activations, batch folded onto the lane axis.
    not_first_ref: (1, NL_pad)    0.0 at per-sample column 0, else 1.0.
    not_last_ref:  (1, NL_pad)    0.0 at per-sample column L-1, else 1.0.
    refs = (w0, b0, ..., w_{n-1}, b_{n-1}, o_ref) where
      w_i: (3*cp_i, cin_i) -- conv taps stacked on rows [k=0; k=1; k=2], each
           tap block padded to cp_i (multiple of 8 rows).
      b_i: (cp_i, 1) f32.
    """
    o_ref = refs[-1]
    params = refs[:-1]
    nl_pad = x_ref.shape[-1]

    not_first = not_first_ref[...]          # (1, NL_pad), f32
    not_last = not_last_ref[...]            # (1, NL_pad), f32

    h = x_ref[...].astype(jnp.float32)      # (Cin, NL_pad)
    for i in range(num_layers):
        w = params[2 * i][...]              # (3*cp, cin), MXU dtype
        b = params[2 * i + 1][...]          # (cp, 1), f32
        cp = b.shape[0]
        # One MXU matmul per layer for ALL taps and the WHOLE batch.
        y3 = jnp.dot(w, h.astype(w.dtype), preferred_element_type=jnp.float32)
        # tap k=0 consumes x[l-1]: rotate lanes right by 1, zero each sample's col 0.
        # tap k=2 consumes x[l+1]: rotate lanes left by 1, zero each sample's col L-1.
        left = pltpu.roll(y3[:cp], shift=1, axis=1) * not_first
        right = pltpu.roll(y3[2 * cp:], shift=nl_pad - 1, axis=1) * not_last
        h = left + y3[cp:2 * cp] + right + b
        if i < num_layers - 1:              # Tanh between convs only
            h = jnp.tanh(h)
    o_ref[...] = h.astype(o_ref.dtype)


def _pack_params(weights, biases, mxu_dtype):
    """Pre-pack PyTorch Conv1d params: taps stacked on rows, 8-row aligned blocks."""
    packed = []
    prev_pad = weights[0].shape[1]          # layer-0 input channels (unpadded)
    for w, b in zip(weights, biases):
        co, ci, k = w.shape
        assert k == 3 and ci <= prev_pad
        co_pad = _round_up(co, 8)
        w_full = jnp.zeros((3, co_pad, prev_pad), jnp.float32)
        w_full = w_full.at[:, :co, :ci].set(jnp.transpose(w, (2, 0, 1)))
        w_stack = w_full.reshape(3 * co_pad, prev_pad).astype(mxu_dtype)
        b_col = jnp.zeros((co_pad, 1), jnp.float32).at[:co, 0].set(b)
        packed += [w_stack, b_col]
        prev_pad = co_pad
    return packed


def odesde_forward(x_ncl, weights, biases, *, mxu_dtype=jnp.float32):
    """x_ncl: (N, Cin, L) (PyTorch NCL layout).

    weights[i]: (cout, cin, 3)  -- PyTorch Conv1d weight layout.
    biases[i]:  (cout,)
    mxu_dtype:  dtype of the matmul operands (bf16 recommended on v6e/v7x);
                accumulation, bias-add and tanh always run in f32.
    """
    n_batch, c_in, seq_len = x_ncl.shape
    num_layers = len(weights)
    c_out = weights[-1].shape[0]

    nl = n_batch * seq_len
    nl_pad = _round_up(max(nl, 128), 128)

    # Channels-first, batch folded onto the lane axis, zero-padded to 128 lanes.
    x2 = jnp.transpose(x_ncl, (1, 0, 2)).reshape(c_in, nl).astype(jnp.float32)
    x2 = jnp.pad(x2, ((0, 0), (0, nl_pad - nl)))

    # Per-sample boundary masks (hoisted out of the kernel entirely).
    pos = (jnp.arange(nl_pad, dtype=jnp.int32) % seq_len)[None, :]
    not_first = (pos != 0).astype(jnp.float32)
    not_last = (pos != seq_len - 1).astype(jnp.float32)

    params = _pack_params(weights, biases, mxu_dtype)
    c_out_pad = params[-1].shape[0]

    vmem = pl.BlockSpec(memory_space=pltpu.MemorySpace.VMEM)

    flops = 0
    transcendentals = 0
    param_bytes = 0
    for i in range(num_layers):
        w_stack, b_col = params[2 * i], params[2 * i + 1]
        m, kdim = w_stack.shape
        flops += 2 * m * kdim * nl_pad
        if i < num_layers - 1:
            transcendentals += (m // 3) * nl_pad
        param_bytes += int(w_stack.size) * w_stack.dtype.itemsize + int(b_col.size) * 4

    out_pad = pl.pallas_call(
        functools.partial(_odesde_kernel, num_layers),
        out_shape=jax.ShapeDtypeStruct((c_out_pad, nl_pad), jnp.float32),
        in_specs=[vmem] * (3 + len(params)),
        out_specs=vmem,
        cost_estimate=pl.CostEstimate(
            flops=int(flops),
            transcendentals=int(transcendentals),
            bytes_accessed=int(4 * (int(x2.size) + c_out_pad * nl_pad) + param_bytes),
        ),
    )(x2, not_first, not_last, *params)

    out = out_pad[:c_out, :nl].reshape(c_out, n_batch, seq_len)
    return jnp.transpose(out, (1, 0, 2))                    # back to (N, Cout, L)


def _ref_forward(x_ncl, weights, biases):
    """Plain-JAX reference matching PyTorch Conv1d(k=3, s=1, p=1) + Tanh."""
    h = x_ncl
    num_layers = len(weights)
    for i, (w, b) in enumerate(zip(weights, biases)):
        h = jax.lax.conv_general_dilated(
            h, w, window_strides=(1,), padding=((1, 1),),
            dimension_numbers=("NCH", "OIH", "NCH"))
        h = h + b.reshape(1, -1, 1)
        if i < num_layers - 1:
            h = jnp.tanh(h)
    return h


def _init_params(key, in_channels, hidden_channels, out_channels, n_layers,
                 zero_final=True):
    """Deterministic init mimicking Conv1d default uniform init.

    Weights are in PyTorch layout (cout, cin, 3); final conv zeroed when
    zero_final=True (matching zero_module in the PyTorch module).
    """
    pairs = [(in_channels, hidden_channels)]
    pairs += [(hidden_channels, hidden_channels)] * n_layers
    pairs += [(hidden_channels, out_channels)]

    weights, biases = [], []
    for li, (ci, co) in enumerate(pairs):
        key, kw, kb = jax.random.split(key, 3)
        bound = 1.0 / jnp.sqrt(jnp.float32(ci * 3))
        if zero_final and li == len(pairs) - 1:
            w = jnp.zeros((co, ci, 3), jnp.float32)
            b = jnp.zeros((co,), jnp.float32)
        else:
            w = jax.random.uniform(kw, (co, ci, 3), jnp.float32, -bound, bound)
            b = jax.random.uniform(kb, (co,), jnp.float32, -bound, bound)
        weights.append(w)
        biases.append(b)
    return weights, biases


if __name__ == "__main__":
    key = jax.random.PRNGKey(0)
    N, C_IN, HIDDEN, C_OUT, L, N_LAYERS = 2, 4, 32, 4, 16, 2

    key, kx = jax.random.split(key)
    x = jax.random.normal(kx, (N, C_IN, L), jnp.float32)    # PyTorch NCL layout

    # 1) Faithful params (final conv zero-initialized, as in the PyTorch module).
    weights, biases = _init_params(key, C_IN, HIDDEN, C_OUT, N_LAYERS, zero_final=True)
    y = jax.block_until_ready(odesde_forward(x, weights, biases))
    y_ref = _ref_forward(x, weights, biases)
    assert y.shape == (N, C_OUT, L)
    assert jnp.allclose(y, y_ref, atol=1e-5, rtol=1e-5), "mismatch (zero final)"

    # 2) Non-zero final conv so the last layer's numerics are exercised.
    weights2, biases2 = _init_params(jax.random.PRNGKey(1), C_IN, HIDDEN, C_OUT,
                                     N_LAYERS, zero_final=False)
    y2 = jax.block_until_ready(odesde_forward(x, weights2, biases2))
    y2_ref = _ref_forward(x, weights2, biases2)
    assert jnp.allclose(y2, y2_ref, atol=2e-4, rtol=2e-4), "mismatch (nonzero final)"

    # 3) bf16 MXU operands (v6e/v7x fast path); accumulation/tanh stay f32.
    y3 = jax.block_until_ready(
        odesde_forward(x, weights2, biases2, mxu_dtype=jnp.bfloat16))
    assert bool(jnp.isfinite(y3).all())
    assert jnp.allclose(y3, y2_ref, atol=1e-1, rtol=1e-1), "mismatch (bf16 MXU)"

    print("KERNEL_OK")
</pallas_src>

<mosaic_0001>
module attributes {stable_mosaic.version = 11 : i64} {
  func.func @_odesde_kernel(%arg0: memref<4x128xf32, #tpu.memory_space<vmem>>, %arg1: memref<1x128xf32, #tpu.memory_space<vmem>>, %arg2: memref<1x128xf32, #tpu.memory_space<vmem>>, %arg3: memref<96x4xf32, #tpu.memory_space<vmem>>, %arg4: memref<32x1xf32, #tpu.memory_space<vmem>>, %arg5: memref<96x32xf32, #tpu.memory_space<vmem>>, %arg6: memref<32x1xf32, #tpu.memory_space<vmem>>, %arg7: memref<96x32xf32, #tpu.memory_space<vmem>>, %arg8: memref<32x1xf32, #tpu.memory_space<vmem>>, %arg9: memref<24x32xf32, #tpu.memory_space<vmem>>, %arg10: memref<8x1xf32, #tpu.memory_space<vmem>>, %arg11: memref<8x128xf32, #tpu.memory_space<vmem>>) attributes {dimension_semantics = [], scalar_prefetch = 0 : i64, scratch_operands = 0 : i64, tpu.core_type = #tpu.core_type<tc>} {
    %c0 = arith.constant 0 : index
    %c0_0 = arith.constant 0 : index
    %0 = vector.load %arg1[%c0, %c0_0] : memref<1x128xf32, #tpu.memory_space<vmem>>, vector<1x128xf32>
    %c0_1 = arith.constant 0 : index
    %c0_2 = arith.constant 0 : index
    %1 = vector.load %arg2[%c0_1, %c0_2] : memref<1x128xf32, #tpu.memory_space<vmem>>, vector<1x128xf32>
    %c0_3 = arith.constant 0 : index
    %c0_4 = arith.constant 0 : index
    %2 = vector.load %arg0[%c0_3, %c0_4] : memref<4x128xf32, #tpu.memory_space<vmem>>, vector<4x128xf32>
    %c0_5 = arith.constant 0 : index
    %c0_6 = arith.constant 0 : index
    %3 = vector.load %arg3[%c0_5, %c0_6] : memref<96x4xf32, #tpu.memory_space<vmem>>, vector<96x4xf32>
    %c0_7 = arith.constant 0 : index
    %c0_8 = arith.constant 0 : index
    %4 = vector.load %arg4[%c0_7, %c0_8] : memref<32x1xf32, #tpu.memory_space<vmem>>, vector<32x1xf32>
    %cst = arith.constant dense<0.000000e+00> : vector<96x128xf32>
    %5 = tpu.matmul %3, %2, %cst {dimension_numbers = #tpu.dot_dimension_numbers<[1], [0], [0], [1], [0, 0, 1, 1], [], []>} : vector<96x4xf32>, vector<4x128xf32>, vector<96x128xf32> -> vector<96x128xf32>
    %6 = vector.extract_strided_slice %5 {offsets = [0, 0], sizes = [32, 128], strides = [1, 1]} : vector<96x128xf32> to vector<32x128xf32>
    %c1_i32 = arith.constant 1 : i32
    %7 = tpu.dynamic_rotate %6 by %c1_i32 dim 1 : vector<32x128xf32>, i32 -> vector<32x128xf32>
    %8 = vector.broadcast %0 : vector<1x128xf32> to vector<32x128xf32>
    %9 = arith.mulf %7, %8 : vector<32x128xf32>
    %10 = vector.extract_strided_slice %5 {offsets = [64, 0], sizes = [32, 128], strides = [1, 1]} : vector<96x128xf32> to vector<32x128xf32>
    %c127_i32 = arith.constant 127 : i32
    %11 = tpu.dynamic_rotate %10 by %c127_i32 dim 1 : vector<32x128xf32>, i32 -> vector<32x128xf32>
    %12 = vector.broadcast %1 : vector<1x128xf32> to vector<32x128xf32>
    %13 = arith.mulf %11, %12 : vector<32x128xf32>
    %14 = vector.extract_strided_slice %5 {offsets = [32, 0], sizes = [32, 128], strides = [1, 1]} : vector<96x128xf32> to vector<32x128xf32>
    %15 = arith.addf %9, %14 : vector<32x128xf32>
    %16 = arith.addf %15, %13 : vector<32x128xf32>
    %17 = vector.broadcast %4 : vector<32x1xf32> to vector<32x128xf32>
    %18 = arith.addf %16, %17 : vector<32x128xf32>
    %19 = math.tanh %18 : vector<32x128xf32>
    %c0_9 = arith.constant 0 : index
    %c0_10 = arith.constant 0 : index
    %20 = vector.load %arg5[%c0_9, %c0_10] : memref<96x32xf32, #tpu.memory_space<vmem>>, vector<96x32xf32>
    %c0_11 = arith.constant 0 : index
    %c0_12 = arith.constant 0 : index
    %21 = vector.load %arg6[%c0_11, %c0_12] : memref<32x1xf32, #tpu.memory_space<vmem>>, vector<32x1xf32>
    %cst_13 = arith.constant dense<0.000000e+00> : vector<96x128xf32>
    %22 = tpu.matmul %20, %19, %cst_13 {dimension_numbers = #tpu.dot_dimension_numbers<[1], [0], [0], [1], [0, 0, 1, 1], [], []>} : vector<96x32xf32>, vector<32x128xf32>, vector<96x128xf32> -> vector<96x128xf32>
    %23 = vector.extract_strided_slice %22 {offsets = [0, 0], sizes = [32, 128], strides = [1, 1]} : vector<96x128xf32> to vector<32x128xf32>
    %c1_i32_14 = arith.constant 1 : i32
    %24 = tpu.dynamic_rotate %23 by %c1_i32_14 dim 1 : vector<32x128xf32>, i32 -> vector<32x128xf32>
    %25 = vector.broadcast %0 : vector<1x128xf32> to vector<32x128xf32>
    %26 = arith.mulf %24, %25 : vector<32x128xf32>
    %27 = vector.extract_strided_slice %22 {offsets = [64, 0], sizes = [32, 128], strides = [1, 1]} : vector<96x128xf32> to vector<32x128xf32>
    %c127_i32_15 = arith.constant 127 : i32
    %28 = tpu.dynamic_rotate %27 by %c127_i32_15 dim 1 : vector<32x128xf32>, i32 -> vector<32x128xf32>
    %29 = vector.broadcast %1 : vector<1x128xf32> to vector<32x128xf32>
    %30 = arith.mulf %28, %29 : vector<32x128xf32>
    %31 = vector.extract_strided_slice %22 {offsets = [32, 0], sizes = [32, 128], strides = [1, 1]} : vector<96x128xf32> to vector<32x128xf32>
    %32 = arith.addf %26, %31 : vector<32x128xf32>
    %33 = arith.addf %32, %30 : vector<32x128xf32>
    %34 = vector.broadcast %21 : vector<32x1xf32> to vector<32x128xf32>
    %35 = arith.addf %33, %34 : vector<32x128xf32>
    %36 = math.tanh %35 : vector<32x128xf32>
    %c0_16 = arith.constant 0 : index
    %c0_17 = arith.constant 0 : index
    %37 = vector.load %arg7[%c0_16, %c0_17] : memref<96x32xf32, #tpu.memory_space<vmem>>, vector<96x32xf32>
    %c0_18 = arith.constant 0 : index
    %c0_19 = arith.constant 0 : index
    %38 = vector.load %arg8[%c0_18, %c0_19] : memref<32x1xf32, #tpu.memory_space<vmem>>, vector<32x1xf32>
    %cst_20 = arith.constant dense<0.000000e+00> : vector<96x128xf32>
    %39 = tpu.matmul %37, %36, %cst_20 {dimension_numbers = #tpu.dot_dimension_numbers<[1], [0], [0], [1], [0, 0, 1, 1], [], []>} : vector<96x32xf32>, vector<32x128xf32>, vector<96x128xf32> -> vector<96x128xf32>
    %40 = vector.extract_strided_slice %39 {offsets = [0, 0], sizes = [32, 128], strides = [1, 1]} : vector<96x128xf32> to vector<32x128xf32>
    %c1_i32_21 = arith.constant 1 : i32
    %41 = tpu.dynamic_rotate %40 by %c1_i32_21 dim 1 : vector<32x128xf32>, i32 -> vector<32x128xf32>
    %42 = vector.broadcast %0 : vector<1x128xf32> to vector<32x128xf32>
    %43 = arith.mulf %41, %42 : vector<32x128xf32>
    %44 = vector.extract_strided_slice %39 {offsets = [64, 0], sizes = [32, 128], strides = [1, 1]} : vector<96x128xf32> to vector<32x128xf32>
    %c127_i32_22 = arith.constant 127 : i32
    %45 = tpu.dynamic_rotate %44 by %c127_i32_22 dim 1 : vector<32x128xf32>, i32 -> vector<32x128xf32>
    %46 = vector.broadcast %1 : vector<1x128xf32> to vector<32x128xf32>
    %47 = arith.mulf %45, %46 : vector<32x128xf32>
    %48 = vector.extract_strided_slice %39 {offsets = [32, 0], sizes = [32, 128], strides = [1, 1]} : vector<96x128xf32> to vector<32x128xf32>
    %49 = arith.addf %43, %48 : vector<32x128xf32>
    %50 = arith.addf %49, %47 : vector<32x128xf32>
    %51 = vector.broadcast %38 : vector<32x1xf32> to vector<32x128xf32>
    %52 = arith.addf %50, %51 : vector<32x128xf32>
    %53 = math.tanh %52 : vector<32x128xf32>
    %c0_23 = arith.constant 0 : index
    %c0_24 = arith.constant 0 : index
    %54 = vector.load %arg9[%c0_23, %c0_24] : memref<24x32xf32, #tpu.memory_space<vmem>>, vector<24x32xf32>
    %c0_25 = arith.constant 0 : index
    %c0_26 = arith.constant 0 : index
    %55 = vector.load %arg10[%c0_25, %c0_26] : memref<8x1xf32, #tpu.memory_space<vmem>>, vector<8x1xf32>
    %cst_27 = arith.constant dense<0.000000e+00> : vector<24x128xf32>
    %56 = tpu.matmul %54, %53, %cst_27 {dimension_numbers = #tpu.dot_dimension_numbers<[1], [0], [0], [1], [0, 0, 1, 1], [], []>} : vector<24x32xf32>, vector<32x128xf32>, vector<24x128xf32> -> vector<24x128xf32>
    %57 = vector.extract_strided_slice %56 {offsets = [0, 0], sizes = [8, 128], strides = [1, 1]} : vector<24x128xf32> to vector<8x128xf32>
    %c1_i32_28 = arith.constant 1 : i32
    %58 = tpu.dynamic_rotate %57 by %c1_i32_28 dim 1 : vector<8x128xf32>, i32 -> vector<8x128xf32>
    %59 = vector.broadcast %0 : vector<1x128xf32> to vector<8x128xf32>
    %60 = arith.mulf %58, %59 : vector<8x128xf32>
    %61 = vector.extract_strided_slice %56 {offsets = [16, 0], sizes = [8, 128], strides = [1, 1]} : vector<24x128xf32> to vector<8x128xf32>
    %c127_i32_29 = arith.constant 127 : i32
    %62 = tpu.dynamic_rotate %61 by %c127_i32_29 dim 1 : vector<8x128xf32>, i32 -> vector<8x128xf32>
    %63 = vector.broadcast %1 : vector<1x128xf32> to vector<8x128xf32>
    %64 = arith.mulf %62, %63 : vector<8x128xf32>
    %65 = vector.extract_strided_slice %56 {offsets = [8, 0], sizes = [8, 128], strides = [1, 1]} : vector<24x128xf32> to vector<8x128xf32>
    %66 = arith.addf %60, %65 : vector<8x128xf32>
    %67 = arith.addf %66, %64 : vector<8x128xf32>
    %68 = vector.broadcast %55 : vector<8x1xf32> to vector<8x128xf32>
    %69 = arith.addf %67, %68 : vector<8x128xf32>
    %c0_30 = arith.constant 0 : index
    %c0_31 = arith.constant 0 : index
    %70 = vector.load %arg11[%c0_30, %c0_31] : memref<8x128xf32, #tpu.memory_space<vmem>>, vector<8x128xf32>
    tpu.vector_store %arg11[%c0_30, %c0_31], %69 {strides = array<i32>} : memref<8x128xf32, #tpu.memory_space<vmem>>, vector<8x128xf32>,
    return
  }
}

</mosaic_0001>

<bundles_post_ra>
// kernel: tpu_custom_call.1
= control target key start
LH: loop header
LB: loop body
LE: loop exit
PB: predicated region body
PF: predicated region fallthrough
CT: control target
= control target key end

     0   :  { %vm95_vm0 = vcmask 1043456   ;;  %vm58_vm1 = vcmask 31744   ;;  %v1155_v4 = vmov 0   ;;  %s1497_s0 = inlined_call_operand.vmem [shape: f32[4,128], index: 0, kind: input, shape index: {}]   ;;  %s1498_s1 = inlined_call_operand.vmem [shape: f32[1,128], index: 1, kind: input, shape index: {}]   ;;  %s1499_s2 = inlined_call_operand.vmem [shape: f32[1,128], index: 2, kind: input, shape index: {}]   ;;  %s1500_s3 = inlined_call_operand.vmem [shape: f32[96,4], index: 3, kind: input, shape index: {}]   ;;  %s1501_s4 = inlined_call_operand.vmem [shape: f32[32,1], index: 4, kind: input, shape index: {}]   ;;  %s1502_s5 = inlined_call_operand.vmem [shape: f32[96,32], index: 5, kind: input, shape index: {}]   ;;  %s1503_s6 = inlined_call_operand.vmem [shape: f32[32,1], index: 6, kind: input, shape index: {}]   ;;  %s1504_s7 = inlined_call_operand.vmem [shape: f32[96,32], index: 7, kind: input, shape index: {}]   ;;  %s1505_s8 = inlined_call_operand.vmem [shape: f32[32,1], index: 8, kind: input, shape index: {}]   ;;  %s1506_s9 = inlined_call_operand.vmem [shape: f32[24,32], index: 9, kind: input, shape index: {}]   ;;  %s1507_s10 = inlined_call_operand.vmem [shape: f32[8,1], index: 10, kind: input, shape index: {}]   ;;  %s1508_s11 = inlined_call_operand.hbm [shape: f32[8,128], index: 11, kind: output, shape index: {}]  }
   0x1   :  { %v41_v0 = vld [vmem:[%s1497_s0] sm:$0xf]  ;;  %v43_v2 = vld [vmem:[%s1500_s3 + $0x8] sm:$0xff]  ;;  %v44_v3 = vld [vmem:[%s1500_s3 + $0x10] sm:$0xff]  ;;  %1105 = vset.pattern.permute.xlu0 %v1155_v4  ;;  %1106 = vset.pattern.permute.xlu1 %v1155_v4 }
   0x2   :  { %v42_v1 = vld [vmem:[%s1500_s3] sm:$0xff]  ;;  %987 = vmatprep.subr.msk.mxu0 %vm95_vm0, %v41_v0  ;;  %v45_v5 = vld [vmem:[%s1500_s3 + $0x18] sm:$0xff] }
   0x3   :  { %989 = vmatprep.mubr.msk.f32.mxu0 %vm58_vm1, %v42_v1  ;;  %988 = vmatpush3.msk.msra.mxu0 %vm95_vm0, %v41_v0  ;;  %v54_v6 = vld [vmem:[%s1501_s4] sm:$0xff]  ;;  %v57_v7 = vld [vmem:[%s1501_s4 + $0x18] sm:$0xff] }
   0x4   :  { %990 = vmatmul.mubr.msk.f32.vlgmr.msra.gmra.mrb[0].mxu0 %vm58_vm1, %v43_v2  ;;  %v46_v8 = vld [vmem:[%s1500_s3 + $0x20] sm:$0xff]  ;;  %270 = vperm.xlu0 %1105, %v54_v6  }
   0x5   :  { %992 = vmatprep.mubr.msk.f32.mxu0 %vm58_vm1, %v44_v3  ;;  %285 = vperm.xlu1 %1106, %v57_v7  }
   0x6   :  { %16 = vsyncpa [#allocation3], 0  ;;  %v55_v9 = vld [vmem:[%s1501_s4 + $0x8] sm:$0xff]  ;;  %v48_v11 = vld [vmem:[%s1500_s3 + $0x30] sm:$0xff]  ;;  %s1156_s29 = smov 1   ;;  %vm312_vm2 = vcmask 261120  }
   0x7   :  { %v47_v10 = vld [vmem:[%s1500_s3 + $0x28] sm:$0xff]  ;;  %v56_v12 = vld [vmem:[%s1501_s4 + $0x10] sm:$0xff]  ;;  %v49_v13 = vld [vmem:[%s1500_s3 + $0x38] sm:$0xff]  ;;  %vm1159_vm3 = vmmov 0  }
   0x8   :  { %993 = vmatmul.mubr.msk.f32.gmra.mrb[2].mxu0 %vm58_vm1, %v45_v5  ;;  %275 = vperm.xlu0 %1105, %v55_v9   ;;  %v50_v14 = vld [vmem:[%s1500_s3 + $0x40] sm:$0xff]  ;;  %v51_v15 = vld [vmem:[%s1500_s3 + $0x48] sm:$0xff]  ;;  %v52_v16 = vld [vmem:[%s1500_s3 + $0x50] sm:$0xff] }
   0x9   :  { %995 = vmatprep.mubr.msk.f32.mxu0 %vm58_vm1, %v46_v8  ;;  %v53_v17 = vld [vmem:[%s1500_s3 + $0x58] sm:$0xff]  ;;  %s1157_s3 = smov 127   ;;  %v309_v30 = vld [vmem:[%s1503_s6 + $0x8] sm:$0xff]  ;;  %v308_v31 = vld [vmem:[%s1503_s6] sm:$0xff] }
   0xa   :  { %v311_v32 = vld [vmem:[%s1503_s6 + $0x18] sm:$0xff]  ;;  %v310_v33 = vld [vmem:[%s1503_s6 + $0x10] sm:$0xff]  ;;  %v296_v34 = vld [vmem:[%s1502_s5] sm:$0xff] }
   0xb   :  { %1015 = vmatprep.mubr.msk.f32.mxu1 %vm312_vm2, %v296_v34  ;;  %v1312_v41 = vld [vmem:[%s1498_s1] ss:$0 sm:$0xff]  ;;  %v547_v34 = vld [vmem:[%s1505_s8 + $0x8] sm:$0xff] }
   0xc   :  { %996 = vmatmul.mubr.msk.f32.gmra.mrb[4].mxu0 %vm58_vm1, %v47_v10  ;;  %280 = vperm.xlu0 %1105, %v56_v12   ;;  %v1319_v46 = vld [vmem:[%s1499_s2] ss:$0 sm:$0xff]  ;;  %v298_v12 = vld [vmem:[%s1502_s5 + $0x10] sm:$0xff] }
   0xd   :  { %998 = vmatprep.mubr.msk.f32.mxu0 %vm58_vm1, %v48_v11  ;;  %v297_v11 = vld [vmem:[%s1502_s5 + $0x8] sm:$0xff] }
  0x10   :  { %999 = vmatmul.mubr.msk.f32.gmra.mrb[6].mxu0 %vm58_vm1, %v49_v13  ;;  %v299_v13 = vld [vmem:[%s1502_s5 + $0x18] sm:$0xff] }
  0x11   :  { %1001 = vmatprep.mubr.msk.f32.mxu0 %vm58_vm1, %v50_v14  ;;  %v300_v14 = vld [vmem:[%s1502_s5 + $0x20] sm:$0xff] }
  0x14   :  { %1002 = vmatmul.mubr.msk.f32.gmra.mrb[8].mxu0 %vm58_vm1, %v51_v15  ;;  %v301_v15 = vld [vmem:[%s1502_s5 + $0x28] sm:$0xff] }
  0x15   :  { %1004 = vmatprep.mubr.msk.f32.mxu0 %vm58_vm1, %v52_v16  ;;  %v302_v16 = vld [vmem:[%s1502_s5 + $0x30] sm:$0xff] }
  0x18   :  { %1005 = vmatmul.mubr.msk.f32.gmra.mrb[10].mxu0 %vm58_vm1, %v53_v17  ;;  %v303_v17 = vld [vmem:[%s1502_s5 + $0x38] sm:$0xff] }
  0x83   :  { %v271_v36 = vpop.permute.xlu0 %270 }
  0x84   :  { %v286_v35 = vpop.permute.xlu1 %285 }
  0x87   :  { %v276_v38 = vpop.permute.xlu0 %275 }
  0x8b   :  { %v281_v40 = vpop.permute.xlu0 %280 }
  0xd7   :  { %v991_v18 = vpop.f32.mrb[0].mxu0 }
  0xd8   :  { %226 = vrot.lane.b32.xlu1 %v991_v18, %s1156_s29  ;;  %v165_v19 = vpop.f32.mrb[1].mxu0  ;;  %v304_v18 = vld [vmem:[%s1502_s5 + $0x40] sm:$0xff] }
  0xdb   :  { %v994_v20 = vpop.f32.mrb[2].mxu0 }
  0xdc   :  { %224 = vrot.lane.b32.xlu1 %v165_v19, %s1156_s29  ;;  %v175_v21 = vpop.f32.mrb[3].mxu0  ;;  %v305_v19 = vld [vmem:[%s1502_s5 + $0x48] sm:$0xff] }
  0xdd   :  { %228 = vrot.lane.b32.xlu0 %v175_v21, %s1156_s29  ;;  %v307_v21 = vld [vmem:[%s1502_s5 + $0x58] sm:$0xff] }
  0xdf   :  { %v997_v22 = vpop.f32.mrb[4].mxu0 }
  0xe0   :  { %230 = vrot.lane.b32.xlu1 %v994_v20, %s1156_s29  ;;  %v185_v23 = vpop.f32.mrb[5].mxu0  ;;  %v306_v20 = vld [vmem:[%s1502_s5 + $0x50] sm:$0xff] }
  0xe3   :  { %v1000_v24 = vpop.f32.mrb[6].mxu0 }
  0xe4   :  { %v195_v25 = vpop.f32.mrb[7].mxu0 }
  0xe7   :  { %v1003_v26 = vpop.f32.mrb[8].mxu0 }
  0xe8   :  { %244 = vrot.lane.b32.xlu1 %v1003_v26, %s1157_s3  ;;  %v205_v27 = vpop.f32.mrb[9].mxu0 }
  0xe9   :  { %242 = vrot.lane.b32.xlu0 %v205_v27, %s1157_s3 }
  0xeb   :  { %v1006_v28 = vpop.f32.mrb[10].mxu0 }
  0xec   :  { %248 = vrot.lane.b32.xlu1 %v1006_v28, %s1157_s3  ;;  %v215_v29 = vpop.f32.mrb[11].mxu0 }
  0xed   :  { %246 = vrot.lane.b32.xlu0 %v215_v29, %s1157_s3 }
  0xf0   :  { %513 = vperm.xlu1 %1106, %v309_v30  }
  0xf1   :  { %508 = vperm.xlu0 %1105, %v308_v31  }
  0xf4   :  { %523 = vperm.xlu1 %1106, %v311_v32  }
  0xf5   :  { %518 = vperm.xlu0 %1105, %v310_v33  }
 0x14a   :  { %v227_v37 = vpop.permute.xlu1 %226 }
 0x14b   :  { %v239_v43 = vmul.f32 %v1312_v41, %v227_v37  ;;  %v548_v37 = vld [vmem:[%s1505_s8 + $0x10] sm:$0xff] }
 0x14d   :  { %v261_v48 = vadd.f32 %v997_v22, %v239_v43 }
 0x14e   :  { %v225_v39 = vpop.permute.xlu1 %224 }
 0x14f   :  { %v229_v44 = vpop.permute.xlu0 %228  ;;  %v238_v45 = vmul.f32 %v1312_v41, %v225_v39 }
 0x150   :  { %v240_v53 = vmul.f32 %v1312_v41, %v229_v44 }
 0x151   :  { %v260_v52 = vadd.f32 %v238_v45, %v185_v23 }
 0x152   :  { %v231_v42 = vpop.permute.xlu1 %230  ;;  %v262_v62 = vadd.f32 %v240_v53, %v195_v25 }
 0x153   :  { %v241_v49 = vmul.f32 %v1312_v41, %v231_v42 }
 0x155   :  { %v263_v58 = vadd.f32 %v1000_v24, %v241_v49 }
 0x15a   :  { %v245_v47 = vpop.permute.xlu1 %244 }
 0x15b   :  { %v257_v50 = vmul.f32 %v1319_v46, %v245_v47  ;;  %v243_v51 = vpop.permute.xlu0 %242 }
 0x15c   :  { %v256_v54 = vmul.f32 %v1319_v46, %v243_v51 }
 0x15d   :  { %v265_v55 = vadd.f32 %v261_v48, %v257_v50 }
 0x15e   :  { %v264_v56 = vadd.f32 %v260_v52, %v256_v54  ;;  %v249_v57 = vpop.permute.xlu1 %248 }
 0x15f   :  { %v289_v59 = vadd.f32 %v276_v38, %v265_v55  ;;  %v259_v60 = vmul.f32 %v1319_v46, %v249_v57  ;;  %v247_v61 = vpop.permute.xlu0 %246  ;;  %v534_v38 = vld [vmem:[%s1504_s7] sm:$0xff] }
 0x160   :  { %v288_v63 = vadd.f32 %v271_v36, %v264_v56  ;;  %v258_v0 = vmul.f32 %v1319_v46, %v247_v61  ;;  %v549_v36 = vld [vmem:[%s1505_s8 + $0x18] sm:$0xff]  ;;  %1041 = vmatprep.mubr.msk.f32.mxu0 %vm312_vm2, %v534_v38 }
 0x161   :  { %1107 = vtanh.f32 %v289_v59  ;;  %v267_v1 = vadd.f32 %v263_v58, %v259_v60 }
 0x162   :  { %1109 = vtanh.f32 %v288_v63  ;;  %v266_v2 = vadd.f32 %v262_v62, %v258_v0 }
 0x163   :  { %v291_v3 = vadd.f32 %v286_v35, %v267_v1  ;;  %v546_v35 = vld [vmem:[%s1505_s8] sm:$0xff] }
 0x164   :  { %v290_v4 = vadd.f32 %v281_v40, %v266_v2 }
 0x165   :  { %1111 = vtanh.f32 %v291_v3 }
 0x166   :  { %1113 = vtanh.f32 %v290_v4 }
 0x16b   :  { %v1108_v5 = vpop.eup %1107 }
 0x16c   :  { %v1110_v6 = vpop.eup %1109 }
 0x16d   :  { %v1076_v7 = vpack.c.bf16 %v1108_v5, %v1110_v6 }
 0x16f   :  { %v1112_v8 = vpop.eup %1111  ;;  %1077 = vmatprep.subr.bf16.mxu1 %v1076_v7  ;;  %v514_v39 = vpop.permute.xlu1 %513 }
 0x170   :  { %v1114_v9 = vpop.eup %1113  ;;  %1079 = vmatpush3.bf16.msra.mxu1 %v1076_v7  ;;  %v509_v40 = vpop.permute.xlu0 %508 }
 0x171   :  { %v1080_v10 = vpack.c.bf16 %v1112_v8, %v1114_v9 }
 0x173   :  { %1081 = vmatprep.subr.bf16.mxu1 %v1080_v10  ;;  %v524_v42 = vpop.permute.xlu1 %523 }
 0x174   :  { %1083 = vmatpush3.bf16.msra.mxu1 %v1080_v10  ;;  %v519_v43 = vpop.permute.xlu0 %518 }
 0x177   :  { %1016 = vmatmul.mubr.msk.f32.vlgmr.msra.gmra.mrb[0].mxu1 %vm312_vm2, %v297_v11 }
 0x178   :  { %1018 = vmatprep.mubr.msk.f32.mxu1 %vm312_vm2, %v298_v12 }
 0x17b   :  { %1019 = vmatmul.mubr.msk.f32.gmra.mrb[2].mxu1 %vm312_vm2, %v299_v13 }
 0x17c   :  { %1021 = vmatprep.mubr.msk.f32.mxu1 %vm312_vm2, %v300_v14 }
 0x17f   :  { %1022 = vmatmul.mubr.msk.f32.gmra.mrb[4].mxu1 %vm312_vm2, %v301_v15  ;;  %v535_v15 = vld [vmem:[%s1504_s7 + $0x8] sm:$0xff] }
 0x180   :  { %1024 = vmatprep.mubr.msk.f32.mxu1 %vm312_vm2, %v302_v16  ;;  %v536_v16 = vld [vmem:[%s1504_s7 + $0x10] sm:$0xff] }
 0x183   :  { %1025 = vmatmul.mubr.msk.f32.gmra.mrb[6].mxu1 %vm312_vm2, %v303_v17  ;;  %v537_v17 = vld [vmem:[%s1504_s7 + $0x18] sm:$0xff] }
 0x184   :  { %1027 = vmatprep.mubr.msk.f32.mxu1 %vm312_vm2, %v304_v18  ;;  %v538_v18 = vld [vmem:[%s1504_s7 + $0x20] sm:$0xff] }
 0x187   :  { %1028 = vmatmul.mubr.msk.f32.gmra.mrb[8].mxu1 %vm312_vm2, %v305_v19  ;;  %v539_v19 = vld [vmem:[%s1504_s7 + $0x28] sm:$0xff] }
 0x188   :  { %1030 = vmatprep.mubr.msk.f32.mxu1 %vm312_vm2, %v306_v20  ;;  %v540_v20 = vld [vmem:[%s1504_s7 + $0x30] sm:$0xff] }
 0x18b   :  { %1031 = vmatmul.mubr.msk.f32.gmra.mrb[10].mxu1 %vm312_vm2, %v307_v21  ;;  %v541_v21 = vld [vmem:[%s1504_s7 + $0x38] sm:$0xff] }
 0x24a   :  { %v1017_v22 = vpop.f32.mrb[0].mxu1 }
 0x24b   :  { %476 = vrot.lane.b32.xlu1 %v1017_v22, %s1156_s29  ;;  %v415_v23 = vpop.f32.mrb[1].mxu1  ;;  %v542_v22 = vld [vmem:[%s1504_s7 + $0x40] sm:$0xff] }
 0x24c   :  { %474 = vrot.lane.b32.xlu0 %v415_v23, %s1156_s29  ;;  %v543_v23 = vld [vmem:[%s1504_s7 + $0x48] sm:$0xff] }
 0x24e   :  { %v1020_v24 = vpop.f32.mrb[2].mxu1 }
 0x24f   :  { %480 = vrot.lane.b32.xlu1 %v1020_v24, %s1156_s29  ;;  %v425_v25 = vpop.f32.mrb[3].mxu1  ;;  %v544_v24 = vld [vmem:[%s1504_s7 + $0x50] sm:$0xff] }
 0x250   :  { %478 = vrot.lane.b32.xlu0 %v425_v25, %s1156_s29  ;;  %v545_v25 = vld [vmem:[%s1504_s7 + $0x58] sm:$0xff] }
 0x252   :  { %v1023_v26 = vpop.f32.mrb[4].mxu1 }
 0x253   :  { %v435_v27 = vpop.f32.mrb[5].mxu1 }
 0x256   :  { %v1026_v28 = vpop.f32.mrb[6].mxu1 }
 0x257   :  { %v445_v29 = vpop.f32.mrb[7].mxu1 }
 0x25a   :  { %v1029_v30 = vpop.f32.mrb[8].mxu1 }
 0x25b   :  { %488 = vrot.lane.b32.xlu1 %v1029_v30, %s1157_s3  ;;  %v455_v31 = vpop.f32.mrb[9].mxu1 }
 0x25c   :  { %486 = vrot.lane.b32.xlu0 %v455_v31, %s1157_s3 }
 0x25e   :  { %v1032_v32 = vpop.f32.mrb[10].mxu1 }
 0x25f   :  { %492 = vrot.lane.b32.xlu1 %v1032_v32, %s1157_s3  ;;  %v465_v33 = vpop.f32.mrb[11].mxu1 }
 0x260   :  { %490 = vrot.lane.b32.xlu0 %v465_v33, %s1157_s3 }
 0x263   :  { %750 = vperm.xlu1 %1106, %v547_v34  }
 0x264   :  { %745 = vperm.xlu0 %1105, %v546_v35   ;;  %v1158_v35 = vmov 0.0|0.0  }
 0x265   :  { %1092 = vmatprep.subr.bf16.mxu1 %v1158_v35 }
 0x267   :  { %760 = vperm.xlu1 %1106, %v549_v36  }
 0x268   :  { %755 = vperm.xlu0 %1105, %v548_v37  }
 0x2bd   :  { %v477_v44 = vpop.permute.xlu1 %476 }
 0x2be   :  { %v475_v45 = vpop.permute.xlu0 %474  ;;  %v483_v48 = vmul.f32 %v1312_v41, %v477_v44 }
 0x2bf   :  { %v482_v50 = vmul.f32 %v1312_v41, %v475_v45 }
 0x2c0   :  { %v499_v52 = vadd.f32 %v1023_v26, %v483_v48 }
 0x2c1   :  { %v481_v47 = vpop.permute.xlu1 %480  ;;  %v498_v56 = vadd.f32 %v482_v50, %v435_v27 }
 0x2c2   :  { %v479_v49 = vpop.permute.xlu0 %478  ;;  %v485_v53 = vmul.f32 %v1312_v41, %v481_v47 }
 0x2c3   :  { %v484_v57 = vmul.f32 %v1312_v41, %v479_v49 }
 0x2c4   :  { %v501_v62 = vadd.f32 %v1026_v28, %v485_v53 }
 0x2c5   :  { %v500_v2 = vadd.f32 %v484_v57, %v445_v29 }
 0x2cd   :  { %v489_v51 = vpop.permute.xlu1 %488 }
 0x2ce   :  { %v495_v54 = vmul.f32 %v1319_v46, %v489_v51  ;;  %v487_v55 = vpop.permute.xlu0 %486 }
 0x2cf   :  { %v494_v58 = vmul.f32 %v1319_v46, %v487_v55 }
 0x2d0   :  { %v503_v59 = vadd.f32 %v499_v52, %v495_v54 }
 0x2d1   :  { %v502_v60 = vadd.f32 %v498_v56, %v494_v58  ;;  %v493_v61 = vpop.permute.xlu1 %492 }
 0x2d2   :  { %v527_v63 = vadd.f32 %v514_v39, %v503_v59  ;;  %v497_v0 = vmul.f32 %v1319_v46, %v493_v61  ;;  %v491_v1 = vpop.permute.xlu0 %490  ;;  %v774_v39 = vld [vmem:[%s1507_s10] sm:$0xff] }
 0x2d3   :  { %v526_v3 = vadd.f32 %v509_v40, %v502_v60  ;;  %v496_v4 = vmul.f32 %v1319_v46, %v491_v1  ;;  %v1160_v40 = vmov 0.0  }
 0x2d4   :  { %1115 = vtanh.f32 %v527_v63  ;;  %v505_v5 = vadd.f32 %v501_v62, %v497_v0  ;;  %1067 = vmatprep.mubr.msk.f32.mxu1 %vm1159_vm3, %v1160_v40 }
 0x2d5   :  { %1117 = vtanh.f32 %v526_v3  ;;  %v504_v6 = vadd.f32 %v500_v2, %v496_v4 }
 0x2d6   :  { %v529_v7 = vadd.f32 %v524_v42, %v505_v5 }
 0x2d7   :  { %v528_v8 = vadd.f32 %v519_v43, %v504_v6 }
 0x2d8   :  { %1119 = vtanh.f32 %v529_v7 }
 0x2d9   :  { %1121 = vtanh.f32 %v528_v8 }
 0x2de   :  { %v1116_v9 = vpop.eup %1115 }
 0x2df   :  { %v1118_v10 = vpop.eup %1117 }
 0x2e0   :  { %v1084_v11 = vpack.c.bf16 %v1116_v9, %v1118_v10 }
 0x2e2   :  { %v1120_v12 = vpop.eup %1119  ;;  %1085 = vmatprep.subr.bf16.mxu0 %v1084_v11  ;;  %v751_v42 = vpop.permute.xlu1 %750 }
 0x2e3   :  { %v1122_v13 = vpop.eup %1121  ;;  %1087 = vmatpush3.bf16.msra.mxu0 %v1084_v11  ;;  %v746_v43 = vpop.permute.xlu0 %745 }
 0x2e4   :  { %v1088_v14 = vpack.c.bf16 %v1120_v12, %v1122_v13 }
 0x2e6   :  { %1089 = vmatprep.subr.bf16.mxu0 %v1088_v14  ;;  %v761_v44 = vpop.permute.xlu1 %760 }
 0x2e7   :  { %1091 = vmatpush3.bf16.msra.mxu0 %v1088_v14  ;;  %v756_v45 = vpop.permute.xlu0 %755 }
 0x2ea   :  { %1042 = vmatmul.mubr.msk.f32.vlgmr.msra.gmra.mrb[12].mxu0 %vm312_vm2, %v535_v15 }
 0x2eb   :  { %1044 = vmatprep.mubr.msk.f32.mxu0 %vm312_vm2, %v536_v16 }
 0x2ee   :  { %1045 = vmatmul.mubr.msk.f32.gmra.mrb[14].mxu0 %vm312_vm2, %v537_v17  ;;  %v771_v17 = vld [vmem:[%s1506_s9] sm:$0xff] }
 0x2ef   :  { %1047 = vmatprep.mubr.msk.f32.mxu0 %vm312_vm2, %v538_v18  ;;  %v772_v18 = vld [vmem:[%s1506_s9 + $0x8] sm:$0xff] }
 0x2f2   :  { %1048 = vmatmul.mubr.msk.f32.gmra.mrb[16].mxu0 %vm312_vm2, %v539_v19  ;;  %v773_v19 = vld [vmem:[%s1506_s9 + $0x10] sm:$0xff]  ;;  %s1161_s9 = smov [#allocation2]  }
 0x2f3   :  { %1050 = vmatprep.mubr.msk.f32.mxu0 %vm312_vm2, %v540_v20  ;;  %s885_s12 = sshll.u32 %s1161_s9, 4  ;;  %s886_s12 = int_to_ptr.vmem [resolvable:$true] %s885_s12 }
 0x2f4   :  { %p1136_p1 = scmp.lt.s32.totalorder %s886_s12, %s886_s12 }
 0x2f6   :  { %1051 = vmatmul.mubr.msk.f32.gmra.mrb[18].mxu0 %vm312_vm2, %v541_v21 }
 0x2f7   :  { %1053 = vmatprep.mubr.msk.f32.mxu0 %vm312_vm2, %v542_v22 }
 0x2fa   :  { %1054 = vmatmul.mubr.msk.f32.gmra.mrb[20].mxu0 %vm312_vm2, %v543_v23 }
 0x2fb   :  { %1056 = vmatprep.mubr.msk.f32.mxu0 %vm312_vm2, %v544_v24 }
 0x2fe   :  { %1057 = vmatmul.mubr.msk.f32.gmra.mrb[22].mxu0 %vm312_vm2, %v545_v25 }
 0x3bd   :  { %v1043_v26 = vpop.f32.mrb[12].mxu0 }
 0x3be   :  { %713 = vrot.lane.b32.xlu1 %v1043_v26, %s1156_s29  ;;  %v652_v27 = vpop.f32.mrb[13].mxu0 }
 0x3bf   :  { %711 = vrot.lane.b32.xlu0 %v652_v27, %s1156_s29 }
 0x3c1   :  { %v1046_v28 = vpop.f32.mrb[14].mxu0 }
 0x3c2   :  { %717 = vrot.lane.b32.xlu1 %v1046_v28, %s1156_s29  ;;  %v662_v29 = vpop.f32.mrb[15].mxu0 }
 0x3c3   :  { %715 = vrot.lane.b32.xlu0 %v662_v29, %s1156_s29 }
 0x3c5   :  { %v1049_v30 = vpop.f32.mrb[16].mxu0 }
 0x3c6   :  { %v672_v31 = vpop.f32.mrb[17].mxu0 }
 0x3c9   :  { %v1052_v32 = vpop.f32.mrb[18].mxu0 }
 0x3ca   :  { %v682_v33 = vpop.f32.mrb[19].mxu0 }
 0x3cd   :  { %v1055_v34 = vpop.f32.mrb[20].mxu0 }
 0x3ce   :  { %725 = vrot.lane.b32.xlu1 %v1055_v34, %s1157_s3  ;;  %v692_v36 = vpop.f32.mrb[21].mxu0 }
 0x3cf   :  { %723 = vrot.lane.b32.xlu0 %v692_v36, %s1157_s3 }
 0x3d1   :  { %v1058_v37 = vpop.f32.mrb[22].mxu0 }
 0x3d2   :  { %729 = vrot.lane.b32.xlu1 %v1058_v37, %s1157_s3  ;;  %v702_v38 = vpop.f32.mrb[23].mxu0 }
 0x3d3   :  { %727 = vrot.lane.b32.xlu0 %v702_v38, %s1157_s3 }
 0x3d7   :  { %874 = vperm.xlu0 %1105, %v774_v39  }
 0x430   :  { %v714_v47 = vpop.permute.xlu1 %713 }
 0x431   :  { %v712_v48 = vpop.permute.xlu0 %711  ;;  %v720_v50 = vmul.f32 %v1312_v41, %v714_v47 }
 0x432   :  { %v719_v52 = vmul.f32 %v1312_v41, %v712_v48 }
 0x433   :  { %v736_v54 = vadd.f32 %v1049_v30, %v720_v50 }
 0x434   :  { %v718_v49 = vpop.permute.xlu1 %717  ;;  %v735_v58 = vadd.f32 %v719_v52, %v672_v31 }
 0x435   :  { %v716_v51 = vpop.permute.xlu0 %715  ;;  %v722_v55 = vmul.f32 %v1312_v41, %v718_v49 }
 0x436   :  { %v721_v59 = vmul.f32 %v1312_v41, %v716_v51 }
 0x437   :  { %v738_v0 = vadd.f32 %v1052_v32, %v722_v55 }
 0x438   :  { %v737_v4 = vadd.f32 %v721_v59, %v682_v33 }
 0x440   :  { %v726_v53 = vpop.permute.xlu1 %725 }
 0x441   :  { %v732_v56 = vmul.f32 %v1319_v46, %v726_v53  ;;  %v724_v57 = vpop.permute.xlu0 %723 }
 0x442   :  { %v731_v60 = vmul.f32 %v1319_v46, %v724_v57 }
 0x443   :  { %v740_v61 = vadd.f32 %v736_v54, %v732_v56 }
 0x444   :  { %v739_v62 = vadd.f32 %v735_v58, %v731_v60  ;;  %v730_v63 = vpop.permute.xlu1 %729 }
 0x445   :  { %v764_v1 = vadd.f32 %v751_v42, %v740_v61  ;;  %v734_v2 = vmul.f32 %v1319_v46, %v730_v63  ;;  %v728_v3 = vpop.permute.xlu0 %727 }
 0x446   :  { %v763_v5 = vadd.f32 %v746_v43, %v739_v62  ;;  %v733_v6 = vmul.f32 %v1319_v46, %v728_v3 }
 0x447   :  { %1123 = vtanh.f32 %v764_v1  ;;  %v742_v7 = vadd.f32 %v738_v0, %v734_v2 }
 0x448   :  { %1125 = vtanh.f32 %v763_v5  ;;  %v741_v8 = vadd.f32 %v737_v4, %v733_v6 }
 0x449   :  { %v766_v9 = vadd.f32 %v761_v44, %v742_v7 }
 0x44a   :  { %v765_v10 = vadd.f32 %v756_v45, %v741_v8 }
 0x44b   :  { %1127 = vtanh.f32 %v766_v9 }
 0x44c   :  { %1129 = vtanh.f32 %v765_v10 }
 0x451   :  { %v1124_v11 = vpop.eup %1123 }
 0x452   :  { %v1126_v12 = vpop.eup %1125 }
 0x453   :  { %v1093_v13 = vpack.c.bf16 %v1124_v11, %v1126_v12 }
 0x455   :  { %v1128_v14 = vpop.eup %1127  ;;  %1094 = vmatpush3.bf16.msra.mxu1 %v1093_v13 }
 0x456   :  { %v1130_v15 = vpop.eup %1129  ;;  %1095 = vmatprep.subr.bf16.mxu1 %v1158_v35  ;;  %v875_v27 = vpop.permute.xlu0 %874 }
 0x457   :  { %v1096_v16 = vpack.c.bf16 %v1128_v14, %v1130_v15 }
 0x459   :  { %1097 = vmatpush3.bf16.msra.mxu1 %v1096_v16 }
 0x45c   :  { %1068 = vmatmul.mubr.msk.f32.vlgmr.msra.gmra.mrb[12].mxu1 %vm312_vm2, %v771_v17 }
 0x45d   :  { %1070 = vmatprep.mubr.msk.f32.mxu1 %vm1159_vm3, %v1160_v40 }
 0x460   :  { %1071 = vmatmul.mubr.msk.f32.gmra.mrb[14].mxu1 %vm312_vm2, %v772_v18 }
 0x461   :  { %1073 = vmatprep.mubr.msk.f32.mxu1 %vm1159_vm3, %v1160_v40 }
 0x464   :  { %1074 = vmatmul.mubr.msk.f32.gmra.mrb[16].mxu1 %vm312_vm2, %v773_v19 }
 0x52f   :  { %v850_v20 = vpop.f32.mrb[12].mxu1 }
 0x530   :  { %864 = vrot.lane.b32.xlu1 %v850_v20, %s1156_s29  ;;  %v1069_v21 = vpop.f32.mrb[13].mxu1  ;;  %s1131_s29 = scalar_lea.vmem %s886_s12, 128 }
 0x531   :  { %p1132_p0 = scmp.ne.s32.totalorder %s886_s12, %s1131_s29  ;;  %p1137_p2 = scmp.lt.s32.totalorder %s1131_s29, %s1131_s29 }
 0x533   :  { %v855_v22 = vpop.f32.mrb[14].mxu1  ;;  %p1138_p3 = por %p1137_p2, %p1136_p1 }
 0x534   :  { %v1072_v23 = vpop.f32.mrb[15].mxu1 }
 0x535   :  { %p1139_p4 = pnand %p1138_p3, %p1132_p0 }
 0x537   :  { %v860_v24 = vpop.f32.mrb[16].mxu1 }
 0x538   :  { %867 = vrot.lane.b32.xlu0 %v860_v24, %s1157_s3  ;;  %v1075_v25 = vpop.f32.mrb[17].mxu1 }
 0x5a2   :  { %v865_v26 = vpop.permute.xlu1 %864 }
 0x5a3   :  { %v866_v28 = vmul.f32 %v1312_v41, %v865_v26 }
 0x5a5   :  { %v870_v30 = vadd.f32 %v866_v28, %v855_v22 }
 0x5aa   :  { %v868_v29 = vpop.permute.xlu0 %867 }
 0x5ab   :  { %v869_v31 = vmul.f32 %v1319_v46, %v868_v29 }
 0x5ad   :  { %v871_v32 = vadd.f32 %v870_v30, %v869_v31 }
 0x5af   :  { %v877_v33 = vadd.f32 %v875_v27, %v871_v32 }
 0x5b1   :  { %878 = vst [vmem:[#allocation2] sm:$0xff] %v877_v33 }
 0x5b2   :  { %1142 = shalt.err (!%p1139_p4)
}
 0x5b3   :  { %s1143_s14 = scalar_lea.hbm %s1508_s11, 128 }
 0x5b4   :  { %p1144_p5 = scmp.ne.s32.totalorder %s1508_s11, %s1143_s14  ;;  %p1147_p6 = scmp.lt.u32.totalorder %s1143_s14, %s1508_s11 }
 0x5b6   :  { %p1149_p7 = pnand %p1147_p6, %p1144_p5 }
 0x5b8   :  { %1152 = shalt.err (!%p1149_p7)
}
 0x5b9   :  { %888 = dma.vmem_to_hbm [thread:$0]  %s886_s12, 128, %s1508_s11, [#allocation3]  }
 0x5ba   :  { %1153 = dma.done.wait [#allocation3], 128  }
 0x5bb   :  { %1154 = vsyncadd [#allocation3], 4294967168 }
 0x5bc   :  { %892 = vsyncpa [#allocation3], 1 }

</bundles_post_ra>
